<compile_context>
chip_gen: v6e
topology: v6e:2x2x1
jax: 0.10.0
libtpu: 0.0.40
codegen_flags: <defaults>
</compile_context>

<pallas_src>
import functools

import jax
import jax.numpy as jnp
import numpy as np
from jax import lax
from jax.experimental import pallas as pl
from jax.experimental.pallas import tpu as pltpu

LANES = 128          # TPU lane width — pad the vocab dim to a multiple of this
NEG_PAD = -1e30      # bias for padded vocab columns -> exp() underflows to 0 in softmax


def _round_up(x, m):
    return ((x + m - 1) // m) * m


def _cbow_kernel(idx_ref, ew_ref, b1_ref, w2_ref, b2_ref, out_ref):
    """Refs (per grid step, all VMEM):
       idx_ref : (TB, C)      int32          context word ids for this row tile
       ew_ref  : (C*Vp, H)    f32/bf16       fused per-slot (padded-emb @ W1-slice)
       b1_ref  : (1, H)       f32
       w2_ref  : (H, Vp)      f32/bf16       linear2 weight, (in, out) layout, V padded
       b2_ref  : (1, Vp)      f32            pad columns = -1e30
       out_ref : (TB, Vp)     f32            log-probs (lane-dense)
    """
    tb, C = idx_ref.shape
    Vp = b2_ref.shape[1]
    wdt = ew_ref.dtype

    idx = idx_ref[...]                                               # (TB, C) int32

    # Per-slot one-hot selectors built in vregs: one (TB, Vp) iota, compared per
    # context slot, lane-concatenated into (TB, C*Vp).  Row r of slot c has a 1 at
    # column idx[r, c]; selection against EW is exact (one-hot row gather).
    lane = lax.broadcasted_iota(jnp.int32, (tb, Vp), 1)              # (TB, Vp)
    sel = jnp.concatenate(
        [(lane == idx[:, c:c + 1]).astype(wdt) for c in range(C)], axis=1)  # (TB, C*Vp)

    # Fused gather+linear1 (+ReLU): one MXU matmul, K = C*Vp, N = H.
    h = jnp.maximum(
        jnp.dot(sel, ew_ref[...], preferred_element_type=jnp.float32) + b1_ref[...],
        0.0)                                                         # (TB, H) f32

    # linear2 (vocab padded to lane-dense Vp).
    logits = jnp.dot(h.astype(w2_ref.dtype), w2_ref[...],
                     preferred_element_type=jnp.float32) + b2_ref[...]   # (TB, Vp)

    # log_softmax over the (padded) vocab axis; padded logits are ~-1e30 -> exp == 0,
    # so the result on the real V columns is exact.
    m = jnp.max(logits, axis=-1, keepdims=True)
    lse = m + jnp.log(jnp.sum(jnp.exp(logits - m), axis=-1, keepdims=True))
    out_ref[...] = logits - lse


def prepare_params(emb_table, w1, b1, w2, b2, *, context_size,
                   param_dtype=jnp.float32):
    """One-time weight layout preparation (NOT in the per-call path).

    PyTorch layouts in : emb (V, D), w1 (H, C*D), b1 (H,), w2 (V, H), b2 (V,).
    Kernel layouts out : ew   (C*Vp, H)  per-slot (padded emb @ W1-slice), stacked
                         b1_r (1, H)     f32
                         w2_p (H, Vp)    zero-padded columns
                         b2_p (1, Vp)    f32, pad columns = -1e30

    param_dtype=jnp.bfloat16 puts the two matmul weights (ew, w2_p) in bf16 for the
    bf16-native MXU on v6e/v7x; biases / accumulation stay f32.
    """
    V, D = emb_table.shape
    H = b1.shape[0]
    C = context_size
    Vp = _round_up(V, LANES)

    emb_p = jnp.zeros((Vp, D), jnp.float32).at[:V, :].set(emb_table.astype(jnp.float32))
    w1_io = jnp.transpose(w1).astype(jnp.float32)                    # (C*D, H)

    # EW: fold the per-slot embedding gather into W1.
    #   row-block c of EW = emb_p @ W1_io[c*D:(c+1)*D, :]            -> (Vp, H)
    ew = jnp.concatenate(
        [emb_p @ w1_io[c * D:(c + 1) * D, :] for c in range(C)], axis=0)  # (C*Vp, H)

    b1_r = b1.reshape(1, H).astype(jnp.float32)
    w2_p = jnp.zeros((H, Vp), jnp.float32).at[:, :V].set(
        jnp.transpose(w2).astype(jnp.float32))                       # (H, Vp)
    b2_p = jnp.full((1, Vp), NEG_PAD, jnp.float32).at[:, :V].set(
        b2.reshape(1, V).astype(jnp.float32))                        # (1, Vp)

    return ew.astype(param_dtype), b1_r, w2_p.astype(param_dtype), b2_p


def cbow_forward(indices, ew, b1_r, w2_p, b2_p, *, block_rows=128):
    """indices: (B, C) int32 context word ids.

    Returns lane-padded (B, Vp=round_up(V,128)) f32 log-probs; real log-probs are
    columns [:, :V] (pad columns are ~ -1e30 - lse and never selected by argmax/NLL).
    """
    B, C = indices.shape
    CVp, H = ew.shape
    Vp = b2_p.shape[1]
    assert CVp == C * Vp
    assert B % block_rows == 0, "batch must be a multiple of the row tile"
    grid = (B // block_rows,)

    return pl.pallas_call(
        _cbow_kernel,
        out_shape=jax.ShapeDtypeStruct((B, Vp), jnp.float32),
        grid=grid,
        in_specs=[
            pl.BlockSpec((block_rows, C), lambda i: (i, 0)),   # context indices (row tile)
            pl.BlockSpec((CVp, H), lambda i: (0, 0)),          # fused emb@W1 (per slot)
            pl.BlockSpec((1, H), lambda i: (0, 0)),            # b1
            pl.BlockSpec((H, Vp), lambda i: (0, 0)),           # W2 (in, out), V padded
            pl.BlockSpec((1, Vp), lambda i: (0, 0)),           # b2, pad cols = -1e30
        ],
        out_specs=pl.BlockSpec((block_rows, Vp), lambda i: (i, 0)),
        compiler_params=pltpu.CompilerParams(
            dimension_semantics=("parallel",)),                # v7x: row tiles split across 2 TCs
    )(indices.astype(jnp.int32), ew, b1_r, w2_p, b2_p)


if __name__ == "__main__":
    raw_text = ('We are about to study the idea of a computational process.\n'
                'Computational processes are abstract beings that inhabit computers.\n'
                'As they evolve, processes manipulate other abstract things called data.\n'
                'The evolution of a process is directed by a pattern of rules\n'
                'called a program. People create programs to direct processes. In effect,\n'
                'we conjure the spirits of the computer with our spells.').split()
    VOCAB_SIZE = len(set(raw_text))       # 49, as in the tutorial
    EMBEDDING_DIM = 10
    CONTEXT_SIZE = 2
    HIDDEN = 128
    BATCH = 256                           # many contexts per call
    # Row tile: BATCH // 2 keeps grid=(2,) (even, >=2) so both v7x TensorCores get a
    # tile; on single-TC v5e/v6e, ROW_TILE = BATCH (grid=(1,)) removes the last bit
    # of per-step overhead.
    ROW_TILE = BATCH // 2

    key = jax.random.PRNGKey(0)
    k_emb, k_w1, k_b1, k_w2, k_b2, k_idx = jax.random.split(key, 6)

    emb_table = jax.random.normal(k_emb, (VOCAB_SIZE, EMBEDDING_DIM), dtype=jnp.float32) * 0.1
    w1 = jax.random.normal(k_w1, (HIDDEN, CONTEXT_SIZE * EMBEDDING_DIM), dtype=jnp.float32) * 0.1
    b1 = jax.random.normal(k_b1, (HIDDEN,), dtype=jnp.float32) * 0.1
    w2 = jax.random.normal(k_w2, (VOCAB_SIZE, HIDDEN), dtype=jnp.float32) * 0.1
    b2 = jax.random.normal(k_b2, (VOCAB_SIZE,), dtype=jnp.float32) * 0.1

    # A batch of contexts: BATCH rows of CONTEXT_SIZE word indices each.
    indices = jax.random.randint(k_idx, (BATCH, CONTEXT_SIZE), 0, VOCAB_SIZE, dtype=jnp.int32)

    # One-time parameter/layout preparation (hoisted out of the per-call path).
    # param_dtype=jnp.bfloat16 is the fast path on v6e/v7x (relax tolerances if used).
    ew, b1_r, w2_p, b2_p = prepare_params(
        emb_table, w1, b1, w2, b2, context_size=CONTEXT_SIZE, param_dtype=jnp.float32)

    forward = jax.jit(functools.partial(cbow_forward, block_rows=ROW_TILE))

    log_probs_padded = forward(indices, ew, b1_r, w2_p, b2_p)
    log_probs_padded = jax.block_until_ready(log_probs_padded)

    # Pure-JAX reference for the exact PyTorch semantics (row-wise).
    embeds = emb_table[indices.reshape(-1)].reshape(BATCH, CONTEXT_SIZE * EMBEDDING_DIM)
    h_ref = jnp.maximum(embeds @ w1.T + b1, 0.0)                 # (B, H)
    logits_ref = h_ref @ w2.T + b2                               # (B, V)
    ref = jax.nn.log_softmax(logits_ref, axis=-1)

    # The kernel returns the lane-padded (B, 128) form; the real log-probs are the
    # first V columns (slicing here is test-only, not part of the per-call path).
    log_probs = np.asarray(log_probs_padded)[:, :VOCAB_SIZE]

    assert log_probs_padded.shape == (BATCH, ((VOCAB_SIZE + LANES - 1) // LANES) * LANES)
    np.testing.assert_allclose(log_probs, np.asarray(ref), atol=1e-4, rtol=1e-4)
    print("KERNEL_OK")
</pallas_src>

<mosaic_0001>
module attributes {stable_mosaic.version = 11 : i64} {
  func.func @_cbow_kernel(%arg0: i32, %arg1: memref<128x2xi32, #tpu.memory_space<vmem>>, %arg2: memref<256x128xf32, #tpu.memory_space<vmem>>, %arg3: memref<1x128xf32, #tpu.memory_space<vmem>>, %arg4: memref<128x128xf32, #tpu.memory_space<vmem>>, %arg5: memref<1x128xf32, #tpu.memory_space<vmem>>, %arg6: memref<128x128xf32, #tpu.memory_space<vmem>>) attributes {dimension_semantics = [#tpu.dimension_semantics<parallel>], iteration_bounds = array<i64: 2>, scalar_prefetch = 0 : i64, scratch_operands = 0 : i64, tpu.core_type = #tpu.core_type<tc>, window_params = [{transform_indices = @transform_0, window_bounds = array<i64: 128, 2>}, {pipeline_mode = #tpu.pipeline_mode<synchronous>, transform_indices = @transform_1, window_bounds = array<i64: 256, 128>}, {pipeline_mode = #tpu.pipeline_mode<synchronous>, transform_indices = @transform_2, window_bounds = array<i64: 1, 128>}, {pipeline_mode = #tpu.pipeline_mode<synchronous>, transform_indices = @transform_3, window_bounds = array<i64: 128, 128>}, {pipeline_mode = #tpu.pipeline_mode<synchronous>, transform_indices = @transform_4, window_bounds = array<i64: 1, 128>}, {transform_indices = @transform_5, window_bounds = array<i64: 128, 128>}]} {
    %c0 = arith.constant 0 : index
    %c0_0 = arith.constant 0 : index
    %0 = vector.load %arg1[%c0, %c0_0] : memref<128x2xi32, #tpu.memory_space<vmem>>, vector<128x2xi32>
    %1 = tpu.iota {dimensions = array<i32: 1>} : vector<128x128xi32>
    %2 = vector.extract_strided_slice %0 {offsets = [0, 0], sizes = [128, 1], strides = [1, 1]} : vector<128x2xi32> to vector<128x1xi32>
    %3 = vector.broadcast %2 : vector<128x1xi32> to vector<128x128xi32>
    %4 = arith.cmpi eq, %1, %3 : vector<128x128xi32>
    %5 = arith.extui %4 : vector<128x128xi1> to vector<128x128xi32>
    %6 = arith.sitofp %5 : vector<128x128xi32> to vector<128x128xf32>
    %7 = vector.extract_strided_slice %0 {offsets = [0, 1], sizes = [128, 1], strides = [1, 1]} : vector<128x2xi32> to vector<128x1xi32>
    %8 = vector.broadcast %7 : vector<128x1xi32> to vector<128x128xi32>
    %9 = arith.cmpi eq, %1, %8 : vector<128x128xi32>
    %10 = arith.extui %9 : vector<128x128xi1> to vector<128x128xi32>
    %11 = arith.sitofp %10 : vector<128x128xi32> to vector<128x128xf32>
    %12 = tpu.concatenate %6, %11 in 1 : vector<128x128xf32>, vector<128x128xf32> -> vector<128x256xf32>
    %c0_1 = arith.constant 0 : index
    %c0_2 = arith.constant 0 : index
    %13 = vector.load %arg2[%c0_1, %c0_2] : memref<256x128xf32, #tpu.memory_space<vmem>>, vector<256x128xf32>
    %cst = arith.constant dense<0.000000e+00> : vector<128x128xf32>
    %14 = tpu.matmul %12, %13, %cst {dimension_numbers = #tpu.dot_dimension_numbers<[1], [0], [0], [1], [0, 0, 1, 1], [], []>} : vector<128x256xf32>, vector<256x128xf32>, vector<128x128xf32> -> vector<128x128xf32>
    %c0_3 = arith.constant 0 : index
    %c0_4 = arith.constant 0 : index
    %15 = vector.load %arg3[%c0_3, %c0_4] : memref<1x128xf32, #tpu.memory_space<vmem>>, vector<1x128xf32>
    %16 = vector.broadcast %15 : vector<1x128xf32> to vector<128x128xf32>
    %17 = arith.addf %14, %16 : vector<128x128xf32>
    %cst_5 = arith.constant 0.000000e+00 : f32
    %18 = vector.broadcast %cst_5 : f32 to vector<128x128xf32>
    %19 = arith.maximumf %17, %18 : vector<128x128xf32>
    %c0_6 = arith.constant 0 : index
    %c0_7 = arith.constant 0 : index
    %20 = vector.load %arg4[%c0_6, %c0_7] : memref<128x128xf32, #tpu.memory_space<vmem>>, vector<128x128xf32>
    %cst_8 = arith.constant dense<0.000000e+00> : vector<128x128xf32>
    %21 = tpu.matmul %19, %20, %cst_8 {dimension_numbers = #tpu.dot_dimension_numbers<[1], [0], [0], [1], [0, 0, 1, 1], [], []>} : vector<128x128xf32>, vector<128x128xf32>, vector<128x128xf32> -> vector<128x128xf32>
    %c0_9 = arith.constant 0 : index
    %c0_10 = arith.constant 0 : index
    %22 = vector.load %arg5[%c0_9, %c0_10] : memref<1x128xf32, #tpu.memory_space<vmem>>, vector<1x128xf32>
    %23 = vector.broadcast %22 : vector<1x128xf32> to vector<128x128xf32>
    %24 = arith.addf %21, %23 : vector<128x128xf32>
    %cst_11 = arith.constant dense<0xFF800000> : vector<128xf32>
    %25 = vector.multi_reduction <maximumf>, %24, %cst_11 [1] : vector<128x128xf32> to vector<128xf32>
    %26 = vector.shape_cast %25 : vector<128xf32> to vector<128x1xf32>
    %27 = vector.broadcast %26 : vector<128x1xf32> to vector<128x128xf32>
    %28 = arith.subf %24, %27 : vector<128x128xf32>
    %29 = math.exp %28 : vector<128x128xf32>
    %cst_12 = arith.constant dense<0.000000e+00> : vector<128xf32>
    %30 = vector.multi_reduction <add>, %29, %cst_12 [1] : vector<128x128xf32> to vector<128xf32>
    %31 = vector.shape_cast %30 : vector<128xf32> to vector<128x1xf32>
    %32 = math.log %31 : vector<128x1xf32>
    %33 = arith.addf %26, %32 : vector<128x1xf32>
    %34 = vector.broadcast %33 : vector<128x1xf32> to vector<128x128xf32>
    %35 = arith.subf %24, %34 : vector<128x128xf32>
    %c0_13 = arith.constant 0 : index
    %c0_14 = arith.constant 0 : index
    %36 = vector.load %arg6[%c0_13, %c0_14] : memref<128x128xf32, #tpu.memory_space<vmem>>, vector<128x128xf32>
    tpu.vector_store %arg6[%c0_13, %c0_14], %35 {strides = array<i32>} : memref<128x128xf32, #tpu.memory_space<vmem>>, vector<128x128xf32>,
    return
  }
  func.func @transform_0(%arg0: i32) -> (i32, i32) {
    %c0_i32 = arith.constant 0 : i32
    %c0_i32_0 = arith.constant 0 : i32
    return %arg0, %c0_i32 : i32, i32
  }
  func.func @transform_1(%arg0: i32) -> (i32, i32) {
    %c0_i32 = arith.constant 0 : i32
    %c0_i32_0 = arith.constant 0 : i32
    %c0_i32_1 = arith.constant 0 : i32
    return %c0_i32, %c0_i32_0 : i32, i32
  }
  func.func @transform_2(%arg0: i32) -> (i32, i32) {
    %c0_i32 = arith.constant 0 : i32
    %c0_i32_0 = arith.constant 0 : i32
    %c0_i32_1 = arith.constant 0 : i32
    return %c0_i32, %c0_i32_0 : i32, i32
  }
  func.func @transform_3(%arg0: i32) -> (i32, i32) {
    %c0_i32 = arith.constant 0 : i32
    %c0_i32_0 = arith.constant 0 : i32
    %c0_i32_1 = arith.constant 0 : i32
    return %c0_i32, %c0_i32_0 : i32, i32
  }
  func.func @transform_4(%arg0: i32) -> (i32, i32) {
    %c0_i32 = arith.constant 0 : i32
    %c0_i32_0 = arith.constant 0 : i32
    %c0_i32_1 = arith.constant 0 : i32
    return %c0_i32, %c0_i32_0 : i32, i32
  }
  func.func @transform_5(%arg0: i32) -> (i32, i32) {
    %c0_i32 = arith.constant 0 : i32
    %c0_i32_0 = arith.constant 0 : i32
    return %arg0, %c0_i32 : i32, i32
  }
}

</mosaic_0001>

<bundles_post_ra>
// kernel: cbow_forward.1
= control target key start
LH: loop header
LB: loop body
LE: loop exit
PB: predicated region body
PF: predicated region fallthrough
CT: control target
= control target key end

     0   :  { %10 = vsyncpa [#allocation3], 0  ;;  %s2100_s0 = inlined_call_operand.vmem [shape: s32[256,2], index: 0, kind: input, shape index: {}]   ;;  %s2101_s1 = inlined_call_operand.vmem [shape: f32[256,128], index: 1, kind: input, shape index: {}]   ;;  %s2102_s2 = inlined_call_operand.vmem [shape: f32[1,128], index: 2, kind: input, shape index: {}]   ;;  %s2103_s3 = inlined_call_operand.hbm [shape: f32[128,128], index: 3, kind: input, shape index: {}]   ;;  %s2104_s4 = inlined_call_operand.vmem [shape: f32[1,128], index: 4, kind: input, shape index: {}]   ;;  %s2105_s5 = inlined_call_operand.hbm [shape: f32[256,128], index: 5, kind: output, shape index: {}]  }
   0x1   :  { %11 = vsyncpa [#allocation4], 0 }
   0x2   :  { %13 = vsyncpa [#allocation4 + $0x1], 0  ;;  %s1606_s18 = smov 0   ;;  %s1608_s19 = smov 0  }
   0x3   :  { %s1610_s20 = smov 0   ;;  %s1612_s21 = smov 0  }
   0x4 LB: > { %s1627_s22 = sadd.s32 4294967295, %s1565_s21   ;;  %s1099_s23 = sadd.s32 4294967294, %s1565_s21   ;;  %s1565_s21 = sphi %s1612_s21, %s2113_s21   ;;  %s1561_s20 = sphi %s1610_s20, %s2112_s20   ;;  %s1557_s19 = sphi %s1608_s19, %s2111_s19   ;;  %s1553_s18 = sphi %s1606_s18, %s2110_s18  }
   0x5   : > { %s1631_s24 = sadd.s32 1, %s1565_s21   ;;  %s136_s25 = sadd.s32 1, %s1561_s20 }
   0x6   : > { %s133_s26 = ssub.s32 %s1565_s21, %s1631_s24  ;;  %p146_p0 = scmp.ne.s32.totalorder %s1561_s20, %s1557_s19 }
   0x7   : > { %p134_p1 = scmp.eq.s32.totalorder %s133_s26, 0  ;;  %p147_p2 = scmp.eq.s32.totalorder %s1627_s22, 1 }
   0x8   : > { %p152_p3 = scmp.ne.s32.totalorder %s1557_s19, %s1553_s18  ;;  %p153_p4 = scmp.eq.s32.totalorder %s1099_s23, 1 }
   0x9   : > { %s1642_s27 = scalar_select %p134_p1, %s1561_s20, %s136_s25  }
   0xa   : > { %p1644_p5 = por %p147_p2, %p146_p0  ;;  %p1648_p6 = por %p153_p4, %p152_p3 }
   0xb   : > { %p1100_p7 = scmp.ge.s32.totalorder %s1565_s21, 1  ;;  %p160_p8 = scmp.lt.s32.totalorder %s1565_s21, 3 }
   0xc   : > { %s2107_s29 = scalar_select %p1648_p6, 1, 0 }
   0xd   : > { %p1362_p9 = scmp.eq.s32.totalorder %s1627_s22, 0  ;;  %p1655_p10 = pnand %p1100_p7, %p160_p8 }
   0xe   : > { %s1567_s6 = smov [#allocation2]  }
   0xf   : > { %s178_s7 = sshll.u32 %s1567_s6, 4  ;;  %p1354_p11 = pneg %p1655_p10  ;;  %s179_s7 = int_to_ptr.vmem [resolvable:$true] %s178_s7 }
  0x10   : > { %s1486_s8 = scalar_lea.vmem %s179_s7, 2048  ;;  %p1494_p3 = scmp.lt.s32.totalorder %s179_s7, %s179_s7 }
  0x11   : > { %p1355_p12 = pnand %p1362_p9, %p1354_p11  ;;  %p1487_p0 = scmp.ne.s32.totalorder %s179_s7, %s1486_s8 }
  0x12   : > { %p1495_p4 = scmp.lt.s32.totalorder %s1486_s8, %s1486_s8 }
  0x13   : > { %p1477_p13 = pneg %p1355_p12 }
  0x14   : > { %p1496_p6 = por %p1495_p4, %p1494_p3 }
  0x15   : > { %p1489_p1 = pnand %p1487_p0, %p1477_p13 }
  0x17   : > { %p1490_p2 = pneg %p1489_p1 }
  0x19   : > { %p1497_p7 = pnand %p1496_p6, %p1490_p2 }
  0x1b   : > { %1500 = shalt.err (!%p1497_p7)
}
  0x1c   : > { %s1568_s9 = smov 128   ;;  %s1569_s10 = smov 8  }
  0x1d   : > { %1357 = dma.hbm_to_vmem [thread:$0]  (!%p1355_p12), %s2103_s3, 2048, %s179_s7, [#allocation3], %s1568_s9, %s1568_s9, %s1569_s10  }
  0x1e   : > { %206 = sbr.rel (%p1655_p10) target bundleno = 959 (0x3bf), region = 40 }
  0x23   : > { %1544 = dma.done.wait (%p1362_p9), [#allocation3], 2048  }
  0x24   : > { %1546 = vsyncadd (%p1362_p9), [#allocation3], 4294965248  ;;  %s1106_s13 = sshll.u32 %s1627_s22, 4  ;;  %v1570_v0 = vmov 1   ;;  %v1571_v3 = vmov 0   ;;  %v482_v4 = vld [vmem:[%s2101_s1 + $0xf8] sm:$0xff]  ;;  %v257_v60 = vlaneseq }
  0x25   : > { %1407 = vset.pattern.permute.xlu1 %v1570_v0  ;;  %1405 = vset.pattern.permute.xlu0 %v1570_v0  ;;  %p235_p6 = scmp.lt.s32.totalorder %s1106_s13, 31  ;;  %v466_v5 = vld [vmem:[%s2101_s1 + $0x78] sm:$0xff]  ;;  %v481_v6 = vld [vmem:[%s2101_s1 + $0xf0] sm:$0xff]  ;;  %v480_v9 = vld [vmem:[%s2101_s1 + $0xe8] sm:$0xff]  ;;  %s231_s9 = sand.u32 1, %s1557_s19  }
  0x26   : > { %1180 = vmatprep.subr.mxu0 %v482_v4  ;;  %v465_v8 = vld [vmem:[%s2101_s1 + $0x70] sm:$0xff]  ;;  %v464_v10 = vld [vmem:[%s2101_s1 + $0x68] sm:$0xff]  ;;  %v479_v12 = vld [vmem:[%s2101_s1 + $0xe0] sm:$0xff]  ;;  %v1794_v61 = vand.u32 127, %v257_v60  ;;  %s1105_s10 = sshll.u32 %s231_s9, 7  ;;  %s1179_s12 = sshll.u32 %s1627_s22, 11 }
  0x27   : > { %s2115_s13 = smov (!%p235_p6, %s1106_s13), 31  ;;  %1181 = vmatpush3.msra.mxu0 %v466_v5  ;;  %v463_v13 = vld [vmem:[%s2101_s1 + $0x60] sm:$0xff]  ;;  %v478_v14 = vld [vmem:[%s2101_s1 + $0xd8] sm:$0xff]  ;;  %v477_v17 = vld [vmem:[%s2101_s1 + $0xd0] sm:$0xff]  ;;  %s2002_s11 = scalar_lea.vmem [#allocation5], %s1105_s10 }
  0x28   : > { %s1107_s14 = sshll.u32 %s2115_s13, 3  ;;  %1182 = vmatprep.subr.mxu0 %v481_v6  ;;  %v462_v15 = vld [vmem:[%s2101_s1 + $0x58] sm:$0xff]  ;;  %v461_v18 = vld [vmem:[%s2101_s1 + $0x50] sm:$0xff]  ;;  %v476_v19 = vld [vmem:[%s2101_s1 + $0xc8] sm:$0xff]  ;;  %s1025_s13 = sshll.u32 %s2002_s11, 4  ;;  %s2053_s13 = int_to_ptr.vmem [resolvable:$true] %s1025_s13 }
  0x29   : > { %s1678_s17 = scalar_lea.vmem %s2100_s0, %s1107_s14  ;;  %1183 = vmatpush3.msra.mxu0 %v465_v8  ;;  %v460_v20 = vld [vmem:[%s2101_s1 + $0x48] sm:$0xff]  ;;  %v475_v22 = vld [vmem:[%s2101_s1 + $0xc0] sm:$0xff]  ;;  %v474_v24 = vld [vmem:[%s2101_s1 + $0xb8] sm:$0xff]  ;;  %s2051_s16 = scalar_lea.hbm %s2105_s5, %s1179_s12 }
  0x2a   : > { %v242_v1 = vld [vmem:[%s1678_s17 + $0x8] sm:$0xff]  ;;  %v241_v2 = vld [vmem:[%s1678_s17] sm:$0xff]  ;;  %v243_v7 = vld [vmem:[%s1678_s17 + $0x10] sm:$0xff]  ;;  %1184 = vmatprep.subr.mxu0 %v480_v9  ;;  %s2060_s22 = scalar_lea.sflag [#allocation4], %s231_s9  ;;  %s1501_s23 = scalar_lea.vmem %s2053_s13, 2048 }
  0x2b   : > { %359 = vperm.xlu1 %1407, %v242_v1   ;;  %356 = vperm.xlu0 %1405, %v241_v2   ;;  %v244_v11 = vld [vmem:[%s1678_s17 + $0x18] sm:$0xff]  ;;  %v245_v16 = vld [vmem:[%s1678_s17 + $0x20] sm:$0xff]  ;;  %v246_v21 = vld [vmem:[%s1678_s17 + $0x28] sm:$0xff]  ;;  %p1502_p8 = scmp.ne.s32.totalorder %s2053_s13, %s1501_s23  ;;  %s1573_s25 = smov [#allocation5]  }
  0x2c   : > { %1185 = vmatpush3.msra.mxu0 %v464_v10  ;;  %v459_v23 = vld [vmem:[%s2101_s1 + $0x40] sm:$0xff]  ;;  %v458_v25 = vld [vmem:[%s2101_s1 + $0x38] sm:$0xff]  ;;  %v247_v26 = vld [vmem:[%s1678_s17 + $0x30] sm:$0xff]  ;;  %s1505_s26 = sshll.u32 %s1573_s25, 4  ;;  %s1506_s26 = int_to_ptr.vmem [resolvable:$false] %s1505_s26 }
  0x2d   : > { %1186 = vmatprep.subr.mxu0 %v479_v12  ;;  %v473_v27 = vld [vmem:[%s2101_s1 + $0xb0] sm:$0xff]  ;;  %v472_v29 = vld [vmem:[%s2101_s1 + $0xa8] sm:$0xff]  ;;  %v248_v31 = vld [vmem:[%s1678_s17 + $0x38] sm:$0xff]  ;;  %p1503_p9 = pnand %p1502_p8, %p1644_p5  ;;  %s1507_s30 = scalar_lea.vmem %s1506_s26, 4096 }
  0x2e   : > { %1187 = vmatpush3.msra.mxu0 %v463_v13  ;;  %v457_v28 = vld [vmem:[%s2101_s1 + $0x30] sm:$0xff]  ;;  %v456_v30 = vld [vmem:[%s2101_s1 + $0x28] sm:$0xff]  ;;  %v471_v32 = vld [vmem:[%s2101_s1 + $0xa0] sm:$0xff]  ;;  %p1508_p11 = scmp.lt.s32.totalorder %s2053_s13, %s1506_s26  ;;  %p1509_p12 = scmp.lt.s32.totalorder %s1507_s30, %s1501_s23 }
  0x2f   : > { %1408 = vset.pattern.permute.xlu1 %v1571_v3  ;;  %1406 = vset.pattern.permute.xlu0 %v1571_v3  ;;  %v455_v33 = vld [vmem:[%s2101_s1 + $0x20] sm:$0xff]  ;;  %v470_v34 = vld [vmem:[%s2101_s1 + $0x98] sm:$0xff]  ;;  %v469_v37 = vld [vmem:[%s2101_s1 + $0x90] sm:$0xff]  ;;  %p1504_p10 = pneg %p1503_p9 }
  0x30   : > { %263 = vperm.xlu1 %1408, %v242_v1   ;;  %260 = vperm.xlu0 %1406, %v241_v2   ;;  %v454_v35 = vld [vmem:[%s2101_s1 + $0x18] sm:$0xff]  ;;  %v249_v36 = vld [vmem:[%s1678_s17 + $0x40] sm:$0xff]  ;;  %v453_v38 = vld [vmem:[%s2101_s1 + $0x10] sm:$0xff]  ;;  %p1510_p13 = por %p1509_p12, %p1508_p11 }
  0x31   : > { %1188 = vmatprep.subr.mxu0 %v478_v14  ;;  %v468_v39 = vld [vmem:[%s2101_s1 + $0x88] sm:$0xff]  ;;  %v467_v42 = vld [vmem:[%s2101_s1 + $0x80] sm:$0xff]  ;;  %v251_v44 = vld [vmem:[%s1678_s17 + $0x50] sm:$0xff] }
  0x32   : > { %1189 = vmatpush3.msra.mxu0 %v462_v15  ;;  %v452_v40 = vld [vmem:[%s2101_s1 + $0x8] sm:$0xff]  ;;  %v451_v43 = vld [vmem:[%s2101_s1] sm:$0xff]  ;;  %v252_v45 = vld [vmem:[%s1678_s17 + $0x58] sm:$0xff]  ;;  %p1511_p0 = pnand %p1510_p13, %p1504_p10 }
  0x33   : > { %1190 = vmatprep.subr.mxu0 %v477_v17  ;;  %v250_v41 = vld [vmem:[%s1678_s17 + $0x48] sm:$0xff]  ;;  %v253_v46 = vld [vmem:[%s1678_s17 + $0x60] sm:$0xff]  ;;  %v255_v48 = vld [vmem:[%s1678_s17 + $0x70] sm:$0xff] }
  0x34   : > { %1409 = vset.pattern.permute.xlu1 %v1570_v0  ;;  %266 = vperm.xlu0 %1406, %v243_v7   ;;  %v254_v47 = vld [vmem:[%s1678_s17 + $0x68] sm:$0xff]  ;;  %v256_v49 = vld [vmem:[%s1678_s17 + $0x78] sm:$0xff]  ;;  %v665_v51 = vld [vmem:[#allocation2 + $0x70] sm:$0xff] }
  0x35   : > { %362 = vperm.xlu1 %1409, %v243_v7   ;;  %1191 = vmatpush3.msra.mxu0 %v461_v18  ;;  %v666_v50 = vld [vmem:[#allocation2 + $0x78] sm:$0xff]  ;;  %v664_v52 = vld [vmem:[#allocation2 + $0x68] sm:$0xff]  ;;  %v663_v53 = vld [vmem:[#allocation2 + $0x60] sm:$0xff] }
  0x36   : > { %1192 = vmatprep.subr.mxu0 %v476_v19  ;;  %1292 = vmatprep.subr.mxu1 %v666_v50  ;;  %v662_v54 = vld [vmem:[#allocation2 + $0x58] sm:$0xff]  ;;  %v661_v55 = vld [vmem:[#allocation2 + $0x50] sm:$0xff]  ;;  %v660_v56 = vld [vmem:[#allocation2 + $0x48] sm:$0xff] }
  0x37   : > { %1193 = vmatpush3.msra.mxu0 %v460_v20  ;;  %1293 = vmatpush3.msra.mxu1 %v666_v50  ;;  %v659_v57 = vld [vmem:[#allocation2 + $0x40] sm:$0xff]  ;;  %v658_v58 = vld [vmem:[#allocation2 + $0x38] sm:$0xff]  ;;  %v657_v59 = vld [vmem:[#allocation2 + $0x30] sm:$0xff] }
  0x38   : > { %269 = vperm.xlu0 %1406, %v244_v11   ;;  %1194 = vmatprep.subr.mxu0 %v475_v22 }
  0x39   : > { %365 = vperm.xlu1 %1409, %v244_v11   ;;  %1195 = vmatpush3.msra.mxu0 %v459_v23 }
  0x3a   : > { %1196 = vmatprep.subr.mxu0 %v474_v24  ;;  %1294 = vmatprep.subr.mxu1 %v665_v51 }
  0x3b   : > { %1197 = vmatpush3.msra.mxu0 %v458_v25  ;;  %1295 = vmatpush3.msra.mxu1 %v665_v51 }
  0x3c   : > { %272 = vperm.xlu0 %1406, %v245_v16   ;;  %1198 = vmatprep.subr.mxu0 %v473_v27 }
  0x3d   : > { %368 = vperm.xlu1 %1409, %v245_v16   ;;  %1199 = vmatpush3.msra.mxu0 %v457_v28 }
  0x3e   : > { %1200 = vmatprep.subr.mxu0 %v472_v29  ;;  %1296 = vmatprep.subr.mxu1 %v664_v52 }
  0x3f   : > { %1201 = vmatpush3.msra.mxu0 %v456_v30  ;;  %1297 = vmatpush3.msra.mxu1 %v664_v52 }
  0x40   : > { %275 = vperm.xlu0 %1406, %v246_v21   ;;  %1202 = vmatprep.subr.mxu0 %v471_v32  ;;  %v655_v32 = vld [vmem:[#allocation2 + $0x20] sm:$0xff] }
  0x41   : > { %371 = vperm.xlu1 %1409, %v246_v21   ;;  %1203 = vmatpush3.msra.mxu0 %v455_v33  ;;  %v654_v33 = vld [vmem:[#allocation2 + $0x18] sm:$0xff] }
  0x42   : > { %1204 = vmatprep.subr.mxu0 %v470_v34  ;;  %1298 = vmatprep.subr.mxu1 %v663_v53  ;;  %v653_v34 = vld [vmem:[#allocation2 + $0x10] sm:$0xff] }
  0x43   : > { %1205 = vmatpush3.msra.mxu0 %v454_v35  ;;  %1299 = vmatpush3.msra.mxu1 %v663_v53  ;;  %v652_v35 = vld [vmem:[#allocation2 + $0x8] sm:$0xff] }
  0x44   : > { %278 = vperm.xlu0 %1406, %v247_v26   ;;  %1206 = vmatprep.subr.mxu0 %v469_v37 }
  0x45   : > { %374 = vperm.xlu1 %1409, %v247_v26   ;;  %1207 = vmatpush3.msra.mxu0 %v453_v38 }
  0x46   : > { %1208 = vmatprep.subr.mxu0 %v468_v39  ;;  %1300 = vmatprep.subr.mxu1 %v662_v54  ;;  %v1863_v39 = vld [vmem:[%s2102_s2] ss:$0 sm:$0xff] }
  0x47   : > { %1209 = vmatpush3.msra.mxu0 %v452_v40  ;;  %1301 = vmatpush3.msra.mxu1 %v662_v54 }
  0x48   : > { %281 = vperm.xlu0 %1406, %v248_v31   ;;  %1210 = vmatprep.subr.mxu0 %v467_v42 }
  0x49   : > { %377 = vperm.xlu1 %1409, %v248_v31   ;;  %1211 = vmatpush3.msra.mxu0 %v451_v43  ;;  %v656_v31 = vld [vmem:[#allocation2 + $0x28] sm:$0xff] }
  0x4a   : > { %1302 = vmatprep.subr.mxu1 %v661_v55 }
  0x4b   : > { %1303 = vmatpush3.msra.mxu1 %v661_v55 }
  0x4c   : > { %284 = vperm.xlu0 %1406, %v249_v36   ;;  %1304 = vmatprep.subr.mxu1 %v660_v56 }
  0x4d   : > { %380 = vperm.xlu1 %1409, %v249_v36   ;;  %1305 = vmatpush3.msra.mxu1 %v660_v56  ;;  %v651_v36 = vld [vmem:[#allocation2] sm:$0xff] }
  0x4e   : > { %1306 = vmatprep.subr.mxu1 %v659_v57 }
  0x4f   : > { %1307 = vmatpush3.msra.mxu1 %v659_v57 }
  0x50   : > { %287 = vperm.xlu0 %1406, %v250_v41   ;;  %1308 = vmatprep.subr.mxu1 %v658_v58 }
  0x51   : > { %383 = vperm.xlu1 %1409, %v250_v41   ;;  %1309 = vmatpush3.msra.mxu1 %v658_v58 }
  0x52   : > { %1310 = vmatprep.subr.mxu1 %v657_v59 }
  0x53   : > { %1311 = vmatpush3.msra.mxu1 %v657_v59 }
  0x54   : > { %290 = vperm.xlu0 %1406, %v251_v44   ;;  %1312 = vmatprep.subr.mxu1 %v656_v31 }
  0x55   : > { %386 = vperm.xlu1 %1409, %v251_v44   ;;  %1313 = vmatpush3.msra.mxu1 %v656_v31 }
  0x56   : > { %1314 = vmatprep.subr.mxu1 %v655_v32 }
  0x57   : > { %1315 = vmatpush3.msra.mxu1 %v655_v32 }
  0x58   : > { %293 = vperm.xlu0 %1406, %v252_v45   ;;  %1316 = vmatprep.subr.mxu1 %v654_v33 }
  0x59   : > { %389 = vperm.xlu1 %1409, %v252_v45   ;;  %1317 = vmatpush3.msra.mxu1 %v654_v33 }
  0x5a   : > { %1318 = vmatprep.subr.mxu1 %v653_v34 }
  0x5b   : > { %1319 = vmatpush3.msra.mxu1 %v653_v34 }
  0x5c   : > { %296 = vperm.xlu0 %1406, %v253_v46   ;;  %1320 = vmatprep.subr.mxu1 %v652_v35 }
  0x5d   : > { %392 = vperm.xlu1 %1409, %v253_v46   ;;  %1321 = vmatpush3.msra.mxu1 %v652_v35 }
  0x5e   : > { %1322 = vmatprep.subr.mxu1 %v651_v36 }
  0x5f   : > { %1323 = vmatpush3.msra.mxu1 %v651_v36 }
  0x60   : > { %299 = vperm.xlu0 %1406, %v254_v47  }
  0x61   : > { %395 = vperm.xlu1 %1409, %v254_v47  }
  0x64   : > { %302 = vperm.xlu0 %1406, %v255_v48  }
  0x65   : > { %398 = vperm.xlu1 %1409, %v255_v48  }
  0x68   : > { %305 = vperm.xlu0 %1406, %v256_v49  }
  0x69   : > { %401 = vperm.xlu1 %1409, %v256_v49  }
  0x6c   : > { %1410 = vset.pattern.permute.xlu0 %v1570_v0  ;;  %v1572_v0 = vmov 1.0  }
  0xa6   : > { %v357_v62 = vpop.permute.xlu0 %356  ;;  %v360_v63 = vpop.permute.xlu1 %359 }
  0xa7   : > { %vm403_vm0 = vcmp.eq.s32.totalorder %v1794_v61, %v357_v62  ;;  %vm404_vm2 = vcmp.eq.s32.totalorder %v1794_v61, %v360_v63 }
  0xa8   : > { %1141 = vmatprep.mubr.msk.f32.mxu0 %vm403_vm0, %v1572_v0 }
  0xab   : > { %v261_v1 = vpop.permute.xlu0 %260  ;;  %v264_v2 = vpop.permute.xlu1 %263 }
  0xac   : > { %vm307_vm1 = vcmp.eq.s32.totalorder %v1794_v61, %v261_v1  ;;  %vm308_vm3 = vcmp.eq.s32.totalorder %v1794_v61, %v264_v2 }
  0xad   : > { %1142 = vmatmul.mubr.msk.f32.vlgmr.msra.gmra.mxu0 %vm307_vm1, %v1572_v0 }
  0xae   : > { %1143 = vmatprep.mubr.msk.f32.mxu0 %vm404_vm2, %v1572_v0 }
  0xaf   : > { %v267_v3 = vpop.permute.xlu0 %266 }
  0xb0   : > { %v363_v4 = vpop.permute.xlu1 %362  ;;  %vm309_vm5 = vcmp.eq.s32.totalorder %v1794_v61, %v267_v3 }
  0xb1   : > { %vm405_vm4 = vcmp.eq.s32.totalorder %v1794_v61, %v363_v4  ;;  %1144 = vmatmul.mubr.msk.f32.gmra.mxu0 %vm308_vm3, %v1572_v0 }
  0xb2   : > { %1145 = vmatprep.mubr.msk.f32.mxu0 %vm405_vm4, %v1572_v0 }
  0xb3   : > { %v270_v5 = vpop.permute.xlu0 %269 }
  0xb4   : > { %v366_v6 = vpop.permute.xlu1 %365  ;;  %vm310_vm7 = vcmp.eq.s32.totalorder %v1794_v61, %v270_v5 }
  0xb5   : > { %vm406_vm6 = vcmp.eq.s32.totalorder %v1794_v61, %v366_v6  ;;  %1146 = vmatmul.mubr.msk.f32.gmra.mxu0 %vm309_vm5, %v1572_v0 }
  0xb6   : > { %1147 = vmatprep.mubr.msk.f32.mxu0 %vm406_vm6, %v1572_v0 }
  0xb7   : > { %v273_v7 = vpop.permute.xlu0 %272 }
  0xb8   : > { %v369_v8 = vpop.permute.xlu1 %368  ;;  %vm311_vm9 = vcmp.eq.s32.totalorder %v1794_v61, %v273_v7 }
  0xb9   : > { %vm407_vm8 = vcmp.eq.s32.totalorder %v1794_v61, %v369_v8  ;;  %1148 = vmatmul.mubr.msk.f32.gmra.mxu0 %vm310_vm7, %v1572_v0 }
  0xba   : > { %1149 = vmatprep.mubr.msk.f32.mxu0 %vm407_vm8, %v1572_v0 }
  0xbb   : > { %v276_v9 = vpop.permute.xlu0 %275 }
  0xbc   : > { %v372_v10 = vpop.permute.xlu1 %371  ;;  %vm312_vm11 = vcmp.eq.s32.totalorder %v1794_v61, %v276_v9 }
  0xbd   : > { %vm408_vm10 = vcmp.eq.s32.totalorder %v1794_v61, %v372_v10  ;;  %1150 = vmatmul.mubr.msk.f32.gmra.mxu0 %vm311_vm9, %v1572_v0 }
  0xbe   : > { %1151 = vmatprep.mubr.msk.f32.mxu0 %vm408_vm10, %v1572_v0 }
  0xbf   : > { %v279_v11 = vpop.permute.xlu0 %278 }
  0xc0   : > { %v375_v12 = vpop.permute.xlu1 %374  ;;  %vm313_vm13 = vcmp.eq.s32.totalorder %v1794_v61, %v279_v11 }
  0xc1   : > { %vm409_vm12 = vcmp.eq.s32.totalorder %v1794_v61, %v375_v12  ;;  %1152 = vmatmul.mubr.msk.f32.gmra.mxu0 %vm312_vm11, %v1572_v0 }
  0xc2   : > { %1153 = vmatprep.mubr.msk.f32.mxu0 %vm409_vm12, %v1572_v0 }
  0xc3   : > { %v282_v13 = vpop.permute.xlu0 %281 }
  0xc4   : > { %v378_v14 = vpop.permute.xlu1 %377  ;;  %vm314_vm15 = vcmp.eq.s32.totalorder %v1794_v61, %v282_v13 }
  0xc5   : > { %vm410_vm14 = vcmp.eq.s32.totalorder %v1794_v61, %v378_v14  ;;  %1154 = vmatmul.mubr.msk.f32.gmra.mxu0 %vm313_vm13, %v1572_v0 }
  0xc6   : > { %1155 = vmatprep.mubr.msk.f32.mxu0 %vm410_vm14, %v1572_v0 }
  0xc7   : > { %v285_v15 = vpop.permute.xlu0 %284 }
  0xc8   : > { %v381_v16 = vpop.permute.xlu1 %380  ;;  %vm315_vm1 = vcmp.eq.s32.totalorder %v1794_v61, %v285_v15 }
  0xc9   : > { %vm411_vm0 = vcmp.eq.s32.totalorder %v1794_v61, %v381_v16  ;;  %1156 = vmatmul.mubr.msk.f32.gmra.mxu0 %vm314_vm15, %v1572_v0 }
  0xca   : > { %1157 = vmatprep.mubr.msk.f32.mxu0 %vm411_vm0, %v1572_v0 }
  0xcb   : > { %v288_v17 = vpop.permute.xlu0 %287 }
  0xcc   : > { %v384_v18 = vpop.permute.xlu1 %383  ;;  %vm316_vm3 = vcmp.eq.s32.totalorder %v1794_v61, %v288_v17 }
  0xcd   : > { %vm412_vm2 = vcmp.eq.s32.totalorder %v1794_v61, %v384_v18  ;;  %1158 = vmatmul.mubr.msk.f32.gmra.mxu0 %vm315_vm1, %v1572_v0 }
  0xce   : > { %1159 = vmatprep.mubr.msk.f32.mxu0 %vm412_vm2, %v1572_v0 }
  0xcf   : > { %v291_v19 = vpop.permute.xlu0 %290 }
  0xd0   : > { %v387_v20 = vpop.permute.xlu1 %386  ;;  %vm317_vm5 = vcmp.eq.s32.totalorder %v1794_v61, %v291_v19 }
  0xd1   : > { %vm413_vm4 = vcmp.eq.s32.totalorder %v1794_v61, %v387_v20  ;;  %1160 = vmatmul.mubr.msk.f32.gmra.mxu0 %vm316_vm3, %v1572_v0 }
  0xd2   : > { %1161 = vmatprep.mubr.msk.f32.mxu0 %vm413_vm4, %v1572_v0 }
  0xd3   : > { %v294_v21 = vpop.permute.xlu0 %293 }
  0xd4   : > { %v390_v22 = vpop.permute.xlu1 %389  ;;  %vm318_vm7 = vcmp.eq.s32.totalorder %v1794_v61, %v294_v21 }
  0xd5   : > { %vm414_vm6 = vcmp.eq.s32.totalorder %v1794_v61, %v390_v22  ;;  %1162 = vmatmul.mubr.msk.f32.gmra.mxu0 %vm317_vm5, %v1572_v0 }
  0xd6   : > { %1163 = vmatprep.mubr.msk.f32.mxu0 %vm414_vm6, %v1572_v0 }
  0xd7   : > { %v297_v23 = vpop.permute.xlu0 %296 }
  0xd8   : > { %v393_v24 = vpop.permute.xlu1 %392  ;;  %vm319_vm9 = vcmp.eq.s32.totalorder %v1794_v61, %v297_v23 }
  0xd9   : > { %vm415_vm8 = vcmp.eq.s32.totalorder %v1794_v61, %v393_v24  ;;  %1164 = vmatmul.mubr.msk.f32.gmra.mxu0 %vm318_vm7, %v1572_v0 }
  0xda   : > { %1165 = vmatprep.mubr.msk.f32.mxu0 %vm415_vm8, %v1572_v0 }
  0xdb   : > { %v300_v25 = vpop.permute.xlu0 %299 }
  0xdc   : > { %v396_v26 = vpop.permute.xlu1 %395  ;;  %vm320_vm11 = vcmp.eq.s32.totalorder %v1794_v61, %v300_v25 }
  0xdd   : > { %vm416_vm10 = vcmp.eq.s32.totalorder %v1794_v61, %v396_v26  ;;  %1166 = vmatmul.mubr.msk.f32.gmra.mxu0 %vm319_vm9, %v1572_v0 }
  0xde   : > { %1167 = vmatprep.mubr.msk.f32.mxu0 %vm416_vm10, %v1572_v0 }
  0xdf   : > { %v303_v27 = vpop.permute.xlu0 %302 }
  0xe0   : > { %v399_v28 = vpop.permute.xlu1 %398  ;;  %vm321_vm13 = vcmp.eq.s32.totalorder %v1794_v61, %v303_v27 }
  0xe1   : > { %vm417_vm12 = vcmp.eq.s32.totalorder %v1794_v61, %v399_v28  ;;  %1168 = vmatmul.mubr.msk.f32.gmra.mxu0 %vm320_vm11, %v1572_v0 }
  0xe2   : > { %1169 = vmatprep.mubr.msk.f32.mxu0 %vm417_vm12, %v1572_v0 }
  0xe3   : > { %v306_v30 = vpop.permute.xlu0 %305 }
  0xe4   : > { %v402_v29 = vpop.permute.xlu1 %401  ;;  %vm322_vm15 = vcmp.eq.s32.totalorder %v1794_v61, %v306_v30 }
  0xe5   : > { %vm418_vm14 = vcmp.eq.s32.totalorder %v1794_v61, %v402_v29  ;;  %1170 = vmatmul.mubr.msk.f32.gmra.mxu0 %vm321_vm13, %v1572_v0 }
  0xe6   : > { %1171 = vmatprep.mubr.msk.f32.mxu0 %vm418_vm14, %v1572_v0 }
  0xe9   : > { %1172 = vmatmul.mubr.msk.f32.gmra.mxu0 %vm322_vm15, %v1572_v0 }
 0x16d   : > { %v1212_v37 = vpop.f32.mrf.mxu0 }
 0x16f   : > { %v1213_v38 = vpop.f32.mrf.mxu0 }
 0x170   : > { %v1214_v40 = vadd.f32 %v1213_v38, %v1212_v37 }
 0x171   : > { %v1215_v41 = vpop.f32.mrf.mxu0 }
 0x172   : > { %v557_v42 = vadd.f32 %v1214_v40, %v1863_v39 }
 0x173   : > { %v1216_v43 = vpop.f32.mrf.mxu0 }
 0x174   : > { %v1217_v44 = vadd.f32 %v1216_v43, %v1215_v41  ;;  %v635_v45 = vmax.f32 %v557_v42, 0.0 }
 0x175   : > { %v1218_v46 = vpop.f32.mrf.mxu0 }
 0x176   : > { %v562_v47 = vadd.f32 %v1217_v44, %v1863_v39  ;;  %1324 = vmatprep.mubr.f32.mxu1 %v635_v45 }
 0x177   : > { %v1219_v48 = vpop.f32.mrf.mxu0 }
 0x178   : > { %v636_v49 = vmax.f32 %v562_v47, 0.0  ;;  %v1220_v50 = vadd.f32 %v1219_v48, %v1218_v46 }
 0x179   : > { %v1221_v51 = vpop.f32.mrf.mxu0 }
 0x17a   : > { %v567_v52 = vadd.f32 %v1220_v50, %v1863_v39  ;;  %1325 = vmatmul.mubr.f32.vlgmr.msra.gmra.mxu1 %v636_v49 }
 0x17b   : > { %v1222_v53 = vpop.f32.mrf.mxu0 }
 0x17c   : > { %v637_v54 = vmax.f32 %v567_v52, 0.0  ;;  %v1223_v55 = vadd.f32 %v1222_v53, %v1221_v51 }
 0x17d   : > { %v1224_v56 = vpop.f32.mrf.mxu0 }
 0x17e   : > { %v572_v57 = vadd.f32 %v1223_v55, %v1863_v39  ;;  %1327 = vmatprep.mubr.f32.mxu1 %v637_v54  ;;  %v1173_v55 = vld [vmem:[%s2104_s4] ss:$0 sm:$0xff] }
 0x17f   : > { %v1225_v58 = vpop.f32.mrf.mxu0 }
 0x180   : > { %v638_v59 = vmax.f32 %v572_v57, 0.0  ;;  %v1226_v60 = vadd.f32 %v1225_v58, %v1224_v56 }
 0x181   : > { %v1227_v61 = vpop.f32.mrf.mxu0 }
 0x182   : > { %v577_v62 = vadd.f32 %v1226_v60, %v1863_v39  ;;  %1328 = vmatmul.mubr.f32.gmra.mxu1 %v638_v59 }
 0x183   : > { %v1228_v63 = vpop.f32.mrf.mxu0 }
 0x184   : > { %v639_v0 = vmax.f32 %v577_v62, 0.0  ;;  %v1229_v1 = vadd.f32 %v1228_v63, %v1227_v61 }
 0x185   : > { %v1230_v2 = vpop.f32.mrf.mxu0 }
 0x186   : > { %v582_v3 = vadd.f32 %v1229_v1, %v1863_v39  ;;  %1330 = vmatprep.mubr.f32.mxu1 %v639_v0 }
 0x187   : > { %v1231_v4 = vpop.f32.mrf.mxu0 }
 0x188   : > { %v640_v5 = vmax.f32 %v582_v3, 0.0  ;;  %v1232_v6 = vadd.f32 %v1231_v4, %v1230_v2 }
 0x189   : > { %v1233_v7 = vpop.f32.mrf.mxu0 }
 0x18a   : > { %v587_v8 = vadd.f32 %v1232_v6, %v1863_v39  ;;  %1331 = vmatmul.mubr.f32.gmra.mxu1 %v640_v5 }
 0x18b   : > { %v1234_v9 = vpop.f32.mrf.mxu0 }
 0x18c   : > { %v641_v10 = vmax.f32 %v587_v8, 0.0  ;;  %v1235_v11 = vadd.f32 %v1234_v9, %v1233_v7 }
 0x18d   : > { %v1236_v12 = vpop.f32.mrf.mxu0 }
 0x18e   : > { %v592_v13 = vadd.f32 %v1235_v11, %v1863_v39  ;;  %1333 = vmatprep.mubr.f32.mxu1 %v641_v10 }
 0x18f   : > { %v1237_v14 = vpop.f32.mrf.mxu0 }
 0x190   : > { %v642_v15 = vmax.f32 %v592_v13, 0.0  ;;  %v1238_v16 = vadd.f32 %v1237_v14, %v1236_v12 }
 0x191   : > { %v1239_v17 = vpop.f32.mrf.mxu0 }
 0x192   : > { %v597_v18 = vadd.f32 %v1238_v16, %v1863_v39  ;;  %1334 = vmatmul.mubr.f32.gmra.mxu1 %v642_v15 }
 0x193   : > { %v1240_v19 = vpop.f32.mrf.mxu0 }
 0x194   : > { %v643_v20 = vmax.f32 %v597_v18, 0.0  ;;  %v1241_v21 = vadd.f32 %v1240_v19, %v1239_v17 }
 0x195   : > { %v1242_v22 = vpop.f32.mrf.mxu0 }
 0x196   : > { %v602_v23 = vadd.f32 %v1241_v21, %v1863_v39  ;;  %1336 = vmatprep.mubr.f32.mxu1 %v643_v20 }
 0x197   : > { %v1243_v24 = vpop.f32.mrf.mxu0 }
 0x198   : > { %v644_v25 = vmax.f32 %v602_v23, 0.0  ;;  %v1244_v26 = vadd.f32 %v1243_v24, %v1242_v22 }
 0x199   : > { %v1245_v27 = vpop.f32.mrf.mxu0 }
 0x19a   : > { %v607_v28 = vadd.f32 %v1244_v26, %v1863_v39  ;;  %1337 = vmatmul.mubr.f32.gmra.mxu1 %v644_v25 }
 0x19b   : > { %v1246_v29 = vpop.f32.mrf.mxu0 }
 0x19c   : > { %v645_v30 = vmax.f32 %v607_v28, 0.0  ;;  %v1247_v31 = vadd.f32 %v1246_v29, %v1245_v27 }
 0x19d   : > { %v1248_v32 = vpop.f32.mrf.mxu0 }
 0x19e   : > { %v612_v33 = vadd.f32 %v1247_v31, %v1863_v39  ;;  %1339 = vmatprep.mubr.f32.mxu1 %v645_v30 }
 0x19f   : > { %v1249_v34 = vpop.f32.mrf.mxu0 }
 0x1a0   : > { %v646_v35 = vmax.f32 %v612_v33, 0.0  ;;  %v1250_v36 = vadd.f32 %v1249_v34, %v1248_v32 }
 0x1a1   : > { %v1251_v37 = vpop.f32.mrf.mxu0 }
 0x1a2   : > { %v617_v38 = vadd.f32 %v1250_v36, %v1863_v39  ;;  %1340 = vmatmul.mubr.f32.gmra.mxu1 %v646_v35 }
 0x1a3   : > { %v1252_v40 = vpop.f32.mrf.mxu0 }
 0x1a4   : > { %v647_v41 = vmax.f32 %v617_v38, 0.0  ;;  %v1253_v42 = vadd.f32 %v1252_v40, %v1251_v37 }
 0x1a5   : > { %v1254_v43 = vpop.f32.mrf.mxu0 }
 0x1a6   : > { %v622_v44 = vadd.f32 %v1253_v42, %v1863_v39  ;;  %1342 = vmatprep.mubr.f32.mxu1 %v647_v41 }
 0x1a7   : > { %v1255_v45 = vpop.f32.mrf.mxu0 }
 0x1a8   : > { %v648_v46 = vmax.f32 %v622_v44, 0.0  ;;  %v1256_v47 = vadd.f32 %v1255_v45, %v1254_v43 }
 0x1a9   : > { %v1257_v48 = vpop.f32.mrf.mxu0 }
 0x1aa   : > { %v627_v49 = vadd.f32 %v1256_v47, %v1863_v39  ;;  %1343 = vmatmul.mubr.f32.gmra.mxu1 %v648_v46 }
 0x1ab   : > { %v1258_v50 = vpop.f32.mrf.mxu0 }
 0x1ac   : > { %v649_v51 = vmax.f32 %v627_v49, 0.0  ;;  %v1259_v52 = vadd.f32 %v1258_v50, %v1257_v48 }
 0x1ae   : > { %v632_v53 = vadd.f32 %v1259_v52, %v1863_v39  ;;  %1345 = vmatprep.mubr.f32.mxu1 %v649_v51 }
 0x1b0   : > { %v650_v54 = vmax.f32 %v632_v53, 0.0 }
 0x1b2   : > { %1346 = vmatmul.mubr.f32.gmra.mxu1 %v650_v54 }
 0x23a   : > { %v1326_v56 = vpop.f32.mrf.mxu1 }
 0x23b   : > { %v1884_v57 = vadd.f32 %v1326_v56, %v1173_v55 }
 0x23c   : > { %v740_v58 = vpop.f32.mrf.mxu1 }
 0x23d   : > { %v1886_v59 = vadd.f32 %v1173_v55, %v740_v58  ;;  %821 = vmax.xlane.f32.xlu0 %v1884_v57 }
 0x23f   : > { %819 = vmax.xlane.f32.xlu1 %v1886_v59 }
 0x242   : > { %v1329_v60 = vpop.f32.mrf.mxu1 }
 0x243   : > { %v1890_v61 = vadd.f32 %v1329_v60, %v1173_v55 }
 0x244   : > { %v750_v39 = vpop.f32.mrf.mxu1 }
 0x245   : > { %v1892_v62 = vadd.f32 %v1173_v55, %v750_v39  ;;  %825 = vmax.xlane.f32.xlu1 %v1890_v61 }
 0x247   : > { %823 = vmax.xlane.f32.xlu0 %v1892_v62 }
 0x24a   : > { %v1332_v63 = vpop.f32.mrf.mxu1 }
 0x24b   : > { %v1896_v0 = vadd.f32 %v1332_v63, %v1173_v55 }
 0x24c   : > { %v760_v1 = vpop.f32.mrf.mxu1 }
 0x24d   : > { %v1898_v2 = vadd.f32 %v1173_v55, %v760_v1  ;;  %829 = vmax.xlane.f32.xlu1 %v1896_v0 }
 0x24f   : > { %827 = vmax.xlane.f32.xlu0 %v1898_v2 }
 0x252   : > { %v1335_v3 = vpop.f32.mrf.mxu1 }
 0x253   : > { %v1902_v4 = vadd.f32 %v1335_v3, %v1173_v55 }
 0x254   : > { %v770_v5 = vpop.f32.mrf.mxu1 }
 0x255   : > { %v1904_v6 = vadd.f32 %v1173_v55, %v770_v5  ;;  %833 = vmax.xlane.f32.xlu1 %v1902_v4 }
 0x257   : > { %831 = vmax.xlane.f32.xlu0 %v1904_v6 }
 0x25a   : > { %v1338_v7 = vpop.f32.mrf.mxu1 }
 0x25b   : > { %v1908_v8 = vadd.f32 %v1338_v7, %v1173_v55 }
 0x25c   : > { %v780_v9 = vpop.f32.mrf.mxu1 }
 0x25d   : > { %v1910_v10 = vadd.f32 %v1173_v55, %v780_v9  ;;  %837 = vmax.xlane.f32.xlu1 %v1908_v8 }
 0x25f   : > { %835 = vmax.xlane.f32.xlu0 %v1910_v10 }
 0x262   : > { %v1341_v11 = vpop.f32.mrf.mxu1 }
 0x263   : > { %v1914_v12 = vadd.f32 %v1341_v11, %v1173_v55 }
 0x264   : > { %v790_v13 = vpop.f32.mrf.mxu1 }
 0x265   : > { %v1916_v14 = vadd.f32 %v1173_v55, %v790_v13  ;;  %841 = vmax.xlane.f32.xlu1 %v1914_v12 }
 0x267   : > { %839 = vmax.xlane.f32.xlu0 %v1916_v14 }
 0x26a   : > { %v1344_v15 = vpop.f32.mrf.mxu1 }
 0x26b   : > { %v1920_v16 = vadd.f32 %v1344_v15, %v1173_v55 }
 0x26c   : > { %v800_v17 = vpop.f32.mrf.mxu1 }
 0x26d   : > { %v1922_v18 = vadd.f32 %v1173_v55, %v800_v17  ;;  %845 = vmax.xlane.f32.xlu1 %v1920_v16 }
 0x26f   : > { %843 = vmax.xlane.f32.xlu0 %v1922_v18 }
 0x272   : > { %v1347_v19 = vpop.f32.mrf.mxu1 }
 0x273   : > { %v1926_v20 = vadd.f32 %v1347_v19, %v1173_v55 }
 0x274   : > { %v810_v21 = vpop.f32.mrf.mxu1 }
 0x275   : > { %v1928_v22 = vadd.f32 %v1173_v55, %v810_v21  ;;  %849 = vmax.xlane.f32.xlu1 %v1926_v20 }
 0x277   : > { %847 = vmax.xlane.f32.xlu0 %v1928_v22 }
 0x2c6   : > { %v1932_v23 = vpop.xlane.xlu0 %821 }
 0x2c7   : > { %v852_v24 = vsub.f32 %v1884_v57, %v1932_v23 }
 0x2c8   : > { %v1936_v25 = vpop.xlane.xlu1 %819 }
 0x2c9   : > { %v869_v26 = vmul.f32 1.442695, %v852_v24  ;;  %v851_v27 = vsub.f32 %v1886_v59, %v1936_v25 }
 0x2cb   : > { %1411 = vpow2.f32 %v869_v26  ;;  %v867_v28 = vmul.f32 1.442695, %v851_v27 }
 0x2cd   : > { %1413 = vpow2.f32 %v867_v28 }
 0x2ce   : > { %v1940_v29 = vpop.xlane.xlu1 %825 }
 0x2cf   : > { %v854_v30 = vsub.f32 %v1890_v61, %v1940_v29 }
 0x2d0   : > { %v1944_v31 = vpop.xlane.xlu0 %823 }
 0x2d1   : > { %v873_v32 = vmul.f32 1.442695, %v854_v30  ;;  %v853_v33 = vsub.f32 %v1892_v62, %v1944_v31 }
 0x2d3   : > { %1415 = vpow2.f32 %v873_v32  ;;  %v871_v34 = vmul.f32 1.442695, %v853_v33 }
 0x2d5   : > { %1417 = vpow2.f32 %v871_v34 }
 0x2d6   : > { %v1948_v35 = vpop.xlane.xlu1 %829 }
 0x2d7   : > { %v856_v36 = vsub.f32 %v1896_v0, %v1948_v35 }
 0x2d8   : > { %v1412_v37 = vpop.eup %1411  ;;  %v1952_v38 = vpop.xlane.xlu0 %827 }
 0x2d9   : > { %v877_v40 = vmul.f32 1.442695, %v856_v36  ;;  %v855_v41 = vsub.f32 %v1898_v2, %v1952_v38  ;;  %901 = vadd.xlane.f32.xlu1 %v1412_v37 }
 0x2da   : > { %v1414_v42 = vpop.eup %1413 }
 0x2db   : > { %1419 = vpow2.f32 %v877_v40  ;;  %v875_v43 = vmul.f32 1.442695, %v855_v41  ;;  %899 = vadd.xlane.f32.xlu0 %v1414_v42 }
 0x2dd   : > { %1421 = vpow2.f32 %v875_v43 }
 0x2de   : > { %v1956_v44 = vpop.xlane.xlu1 %833 }
 0x2df   : > { %v858_v45 = vsub.f32 %v1902_v4, %v1956_v44 }
 0x2e0   : > { %v1416_v46 = vpop.eup %1415  ;;  %v1960_v47 = vpop.xlane.xlu0 %831 }
 0x2e1   : > { %v881_v48 = vmul.f32 1.442695, %v858_v45  ;;  %v857_v49 = vsub.f32 %v1904_v6, %v1960_v47  ;;  %905 = vadd.xlane.f32.xlu1 %v1416_v46 }
 0x2e2   : > { %v1418_v50 = vpop.eup %1417 }
 0x2e3   : > { %1423 = vpow2.f32 %v881_v48  ;;  %v879_v51 = vmul.f32 1.442695, %v857_v49  ;;  %903 = vadd.xlane.f32.xlu0 %v1418_v50 }
 0x2e5   : > { %1425 = vpow2.f32 %v879_v51 }
 0x2e6   : > { %v1964_v52 = vpop.xlane.xlu1 %837 }
 0x2e7   : > { %v860_v53 = vsub.f32 %v1908_v8, %v1964_v52 }
 0x2e8   : > { %v1420_v54 = vpop.eup %1419  ;;  %v1968_v55 = vpop.xlane.xlu0 %835 }
 0x2e9   : > { %v885_v56 = vmul.f32 1.442695, %v860_v53  ;;  %v859_v58 = vsub.f32 %v1910_v10, %v1968_v55  ;;  %909 = vadd.xlane.f32.xlu1 %v1420_v54 }
 0x2ea   : > { %v1422_v60 = vpop.eup %1421 }
 0x2eb   : > { %1427 = vpow2.f32 %v885_v56  ;;  %v883_v39 = vmul.f32 1.442695, %v859_v58  ;;  %907 = vadd.xlane.f32.xlu0 %v1422_v60 }
 0x2ed   : > { %1429 = vpow2.f32 %v883_v39 }
 0x2ee   : > { %v1972_v63 = vpop.xlane.xlu1 %841 }
 0x2ef   : > { %v862_v1 = vsub.f32 %v1914_v12, %v1972_v63 }
 0x2f0   : > { %v1424_v3 = vpop.eup %1423  ;;  %v1976_v5 = vpop.xlane.xlu0 %839 }
 0x2f1   : > { %v889_v7 = vmul.f32 1.442695, %v862_v1  ;;  %v861_v9 = vsub.f32 %v1916_v14, %v1976_v5  ;;  %913 = vadd.xlane.f32.xlu1 %v1424_v3 }
 0x2f2   : > { %v1426_v11 = vpop.eup %1425 }
 0x2f3   : > { %1431 = vpow2.f32 %v889_v7  ;;  %v887_v13 = vmul.f32 1.442695, %v861_v9  ;;  %911 = vadd.xlane.f32.xlu0 %v1426_v11 }
 0x2f5   : > { %1433 = vpow2.f32 %v887_v13 }
 0x2f6   : > { %v1980_v15 = vpop.xlane.xlu1 %845 }
 0x2f7   : > { %v864_v17 = vsub.f32 %v1920_v16, %v1980_v15 }
 0x2f8   : > { %v1428_v19 = vpop.eup %1427  ;;  %v1984_v21 = vpop.xlane.xlu0 %843 }
 0x2f9   : > { %v893_v24 = vmul.f32 1.442695, %v864_v17  ;;  %v863_v26 = vsub.f32 %v1922_v18, %v1984_v21  ;;  %917 = vadd.xlane.f32.xlu1 %v1428_v19 }
 0x2fa   : > { %v1430_v27 = vpop.eup %1429 }
 0x2fb   : > { %1435 = vpow2.f32 %v893_v24  ;;  %v891_v28 = vmul.f32 1.442695, %v863_v26  ;;  %915 = vadd.xlane.f32.xlu0 %v1430_v27 }
 0x2fd   : > { %1437 = vpow2.f32 %v891_v28 }
 0x2fe   : > { %v1988_v30 = vpop.xlane.xlu1 %849 }
 0x2ff   : > { %v866_v32 = vsub.f32 %v1926_v20, %v1988_v30 }
 0x300   : > { %v1432_v33 = vpop.eup %1431  ;;  %v1992_v34 = vpop.xlane.xlu0 %847 }
 0x301   : > { %v897_v36 = vmul.f32 1.442695, %v866_v32  ;;  %v865_v37 = vsub.f32 %v1928_v22, %v1992_v34  ;;  %921 = vadd.xlane.f32.xlu1 %v1432_v33 }
 0x302   : > { %v1434_v40 = vpop.eup %1433 }
 0x303   : > { %1439 = vpow2.f32 %v897_v36  ;;  %v895_v41 = vmul.f32 1.442695, %v865_v37  ;;  %919 = vadd.xlane.f32.xlu0 %v1434_v40 }
 0x305   : > { %1441 = vpow2.f32 %v895_v41 }
 0x308   : > { %v1436_v42 = vpop.eup %1435 }
 0x309   : > { %925 = vadd.xlane.f32.xlu1 %v1436_v42 }
 0x30a   : > { %v1438_v43 = vpop.eup %1437 }
 0x30b   : > { %923 = vadd.xlane.f32.xlu0 %v1438_v43 }
 0x310   : > { %v1440_v45 = vpop.eup %1439 }
 0x311   : > { %929 = vadd.xlane.f32.xlu1 %v1440_v45 }
 0x312   : > { %v1442_v46 = vpop.eup %1441 }
 0x313   : > { %927 = vadd.xlane.f32.xlu0 %v1442_v46 }
 0x362   : > { %v902_v48 = vpop.xlane.xlu1 %901 }
 0x363   : > { %1443 = vlog2.f32 %v902_v48 }
 0x364   : > { %v900_v49 = vpop.xlane.xlu0 %899 }
 0x365   : > { %1445 = vlog2.f32 %v900_v49 }
 0x36a   : > { %v906_v50 = vpop.xlane.xlu1 %905 }
 0x36b   : > { %1447 = vlog2.f32 %v906_v50 }
 0x36c   : > { %v904_v51 = vpop.xlane.xlu0 %903 }
 0x36d   : > { %1449 = vlog2.f32 %v904_v51 }
 0x370   : > { %v1444_v53 = vpop.eup %1443 }
 0x371   : > { %v934_v54 = vmul.f32 0.6931472, %v1444_v53 }
 0x372   : > { %v1446_v56 = vpop.eup %1445  ;;  %v910_v58 = vpop.xlane.xlu1 %909 }
 0x373   : > { %v964_v60 = vadd.f32 %v934_v54, %v1932_v23  ;;  %v932_v39 = vmul.f32 0.6931472, %v1446_v56  ;;  %1451 = vlog2.f32 %v910_v58 }
 0x374   : > { %v908_v1 = vpop.xlane.xlu0 %907 }
 0x375   : > { %v980_v3 = vsub.f32 %v1884_v57, %v964_v60  ;;  %v963_v7 = vadd.f32 %v932_v39, %v1936_v25  ;;  %1453 = vlog2.f32 %v908_v1 }
 0x377   : > { %996 = vst [vmem:[%s2002_s11 + $0x8] sm:$0xff] %v980_v3  ;;  %v979_v9 = vsub.f32 %v1886_v59, %v963_v7 }
 0x378   : > { %v1448_v11 = vpop.eup %1447 }
 0x379   : > { %995 = vst [vmem:[%s2002_s11] sm:$0xff] %v979_v9  ;;  %v938_v23 = vmul.f32 0.6931472, %v1448_v11 }
 0x37a   : > { %v1450_v13 = vpop.eup %1449  ;;  %v914_v17 = vpop.xlane.xlu1 %913 }
 0x37b   : > { %v966_v19 = vadd.f32 %v938_v23, %v1940_v29  ;;  %v936_v57 = vmul.f32 0.6931472, %v1450_v13  ;;  %1455 = vlog2.f32 %v914_v17 }
 0x37c   : > { %v912_v25 = vpop.xlane.xlu0 %911 }
 0x37d   : > { %v982_v24 = vsub.f32 %v1890_v61, %v966_v19  ;;  %v965_v26 = vadd.f32 %v936_v57, %v1944_v31  ;;  %1457 = vlog2.f32 %v912_v25 }
 0x37f   : > { %998 = vst [vmem:[%s2002_s11 + $0x18] sm:$0xff] %v982_v24  ;;  %v981_v59 = vsub.f32 %v1892_v62, %v965_v26 }
 0x380   : > { %v1452_v27 = vpop.eup %1451 }
 0x381   : > { %997 = vst [vmem:[%s2002_s11 + $0x10] sm:$0xff] %v981_v59  ;;  %v942_v28 = vmul.f32 0.6931472, %v1452_v27 }
 0x382   : > { %v1454_v32 = vpop.eup %1453  ;;  %v918_v33 = vpop.xlane.xlu1 %917 }
 0x383   : > { %v968_v29 = vadd.f32 %v942_v28, %v1948_v35  ;;  %v940_v36 = vmul.f32 0.6931472, %v1454_v32  ;;  %1459 = vlog2.f32 %v918_v33 }
 0x384   : > { %v916_v37 = vpop.xlane.xlu0 %915 }
 0x385   : > { %v984_v61 = vsub.f32 %v1896_v0, %v968_v29  ;;  %v967_v31 = vadd.f32 %v940_v36, %v1952_v38  ;;  %1461 = vlog2.f32 %v916_v37 }
 0x387   : > { %1000 = vst [vmem:[%s2002_s11 + $0x28] sm:$0xff] %v984_v61  ;;  %v983_v62 = vsub.f32 %v1898_v2, %v967_v31 }
 0x388   : > { %v1456_v40 = vpop.eup %1455 }
 0x389   : > { %999 = vst [vmem:[%s2002_s11 + $0x20] sm:$0xff] %v983_v62  ;;  %v946_v41 = vmul.f32 0.6931472, %v1456_v40 }
 0x38a   : > { %v1458_v42 = vpop.eup %1457  ;;  %v922_v43 = vpop.xlane.xlu1 %921 }
 0x38b   : > { %v970_v35 = vadd.f32 %v946_v41, %v1956_v44  ;;  %v944_v45 = vmul.f32 0.6931472, %v1458_v42  ;;  %1463 = vlog2.f32 %v922_v43 }
 0x38c   : > { %v920_v46 = vpop.xlane.xlu0 %919 }
 0x38d   : > { %v986_v0 = vsub.f32 %v1902_v4, %v970_v35  ;;  %v969_v38 = vadd.f32 %v944_v45, %v1960_v47  ;;  %1465 = vlog2.f32 %v920_v46 }
 0x38f   : > { %1002 = vst [vmem:[%s2002_s11 + $0x38] sm:$0xff] %v986_v0  ;;  %v985_v2 = vsub.f32 %v1904_v6, %v969_v38 }
 0x390   : > { %v1460_v48 = vpop.eup %1459 }
 0x391   : > { %1001 = vst [vmem:[%s2002_s11 + $0x30] sm:$0xff] %v985_v2  ;;  %v950_v49 = vmul.f32 0.6931472, %v1460_v48 }
 0x392   : > { %v1462_v50 = vpop.eup %1461  ;;  %v926_v51 = vpop.xlane.xlu1 %925 }
 0x393   : > { %v972_v44 = vadd.f32 %v950_v49, %v1964_v52  ;;  %v948_v53 = vmul.f32 0.6931472, %v1462_v50  ;;  %1467 = vlog2.f32 %v926_v51 }
 0x394   : > { %v924_v54 = vpop.xlane.xlu0 %923 }
 0x395   : > { %v988_v4 = vsub.f32 %v1908_v8, %v972_v44  ;;  %v971_v47 = vadd.f32 %v948_v53, %v1968_v55  ;;  %1469 = vlog2.f32 %v924_v54 }
 0x397   : > { %1004 = vst [vmem:[%s2002_s11 + $0x48] sm:$0xff] %v988_v4  ;;  %v987_v6 = vsub.f32 %v1910_v10, %v971_v47 }
 0x398   : > { %v1464_v56 = vpop.eup %1463 }
 0x399   : > { %1003 = vst [vmem:[%s2002_s11 + $0x40] sm:$0xff] %v987_v6  ;;  %v954_v58 = vmul.f32 0.6931472, %v1464_v56 }
 0x39a   : > { %v1466_v60 = vpop.eup %1465  ;;  %v930_v39 = vpop.xlane.xlu1 %929 }
 0x39b   : > { %v974_v52 = vadd.f32 %v954_v58, %v1972_v63  ;;  %v952_v1 = vmul.f32 0.6931472, %v1466_v60  ;;  %1471 = vlog2.f32 %v930_v39 }
 0x39c   : > { %v928_v3 = vpop.xlane.xlu0 %927 }
 0x39d   : > { %v990_v8 = vsub.f32 %v1914_v12, %v974_v52  ;;  %v973_v55 = vadd.f32 %v952_v1, %v1976_v5  ;;  %1473 = vlog2.f32 %v928_v3 }
 0x39f   : > { %1006 = vst [vmem:[%s2002_s11 + $0x58] sm:$0xff] %v990_v8  ;;  %v989_v10 = vsub.f32 %v1916_v14, %v973_v55 }
 0x3a0   : > { %v1468_v7 = vpop.eup %1467 }
 0x3a1   : > { %1005 = vst [vmem:[%s2002_s11 + $0x50] sm:$0xff] %v989_v10  ;;  %v958_v9 = vmul.f32 0.6931472, %v1468_v7 }
 0x3a2   : > { %v1470_v11 = vpop.eup %1469 }
 0x3a3   : > { %v976_v63 = vadd.f32 %v958_v9, %v1980_v15  ;;  %v956_v23 = vmul.f32 0.6931472, %v1470_v11 }
 0x3a5   : > { %v992_v13 = vsub.f32 %v1920_v16, %v976_v63  ;;  %v975_v12 = vadd.f32 %v956_v23, %v1984_v21 }
 0x3a7   : > { %1008 = vst [vmem:[%s2002_s11 + $0x68] sm:$0xff] %v992_v13  ;;  %v991_v5 = vsub.f32 %v1922_v18, %v975_v12 }
 0x3a8   : > { %v1472_v14 = vpop.eup %1471 }
 0x3a9   : > { %1007 = vst [vmem:[%s2002_s11 + $0x60] sm:$0xff] %v991_v5  ;;  %v962_v17 = vmul.f32 0.6931472, %v1472_v14 }
 0x3aa   : > { %v1474_v19 = vpop.eup %1473 }
 0x3ab   : > { %v978_v57 = vadd.f32 %v962_v17, %v1988_v30  ;;  %v960_v25 = vmul.f32 0.6931472, %v1474_v19 }
 0x3ad   : > { %v994_v16 = vsub.f32 %v1926_v20, %v978_v57  ;;  %v977_v15 = vadd.f32 %v960_v25, %v1992_v34 }
 0x3af   : > { %1010 = vst [vmem:[%s2002_s11 + $0x78] sm:$0xff] %v994_v16  ;;  %v993_v18 = vsub.f32 %v1928_v22, %v977_v15 }
 0x3b1   : > { %1009 = vst [vmem:[%s2002_s11 + $0x70] sm:$0xff] %v993_v18 }
 0x3b2   : > { %1514 = shalt.err (!%p1511_p0)
}
 0x3b3   : > { %s1515_s17 = scalar_lea.hbm %s2051_s16, 2048  ;;  %s1519_s8 = scalar_lea.hbm %s2105_s5, 4096 }
 0x3b4   : > { %p1516_p1 = scmp.ne.s32.totalorder %s2051_s16, %s1515_s17  ;;  %p1520_p4 = scmp.lt.s32.totalorder %s2051_s16, %s2105_s5 }
 0x3b5   : > { %p1521_p7 = scmp.lt.s32.totalorder %s1519_s8, %s1515_s17 }
 0x3b6   : > { %p1517_p2 = pnand %p1516_p1, %p1644_p5 }
 0x3b7   : > { %p1522_p6 = por %p1521_p7, %p1520_p4 }
 0x3b8   : > { %p1518_p3 = pneg %p1517_p2 }
 0x3ba   : > { %p1523_p8 = pnand %p1522_p6, %p1518_p3 }
 0x3bc   : > { %1526 = shalt.err (!%p1523_p8)
}
 0x3bd   : > { %s1574_s11 = smov 128   ;;  %s1575_s12 = smov 8  }
 0x3be   : > { %1352 = dma.vmem_to_hbm [thread:$0]  (%p1644_p5), %s2053_s13, 2048, %s2051_s16, %s2060_s22, %s1574_s11, %s1574_s11, %s1575_s12  }
 0x3bf PF: > { %p1364_p9 = scmp.ge.s32.totalorder %s1565_s21, 2  ;;  %s1040_s14 = sand.u32 1, %s1553_s18  }
 0x3c0   : > { %p2109_p10 = scmp.ne.s32.totalorder %s2107_s29, 0  ;;  %s1041_s15 = scalar_lea.sflag [#allocation4], %s1040_s14 }
 0x3c2   : > { %p1359_p11 = pnand %p1364_p9, %p2109_p10 }
 0x3c4   : > { %p1360_p12 = pneg %p1359_p11 }
 0x3c6   : > { %1548 = dma.done.wait (%p1360_p12), %s1041_s15, 2048  }
 0x3c7   : > { %1550 = vsyncadd (%p1360_p12), %s1041_s15, 4294965248  ;;  %p16_p13 = scmp.ge.s32.totalorder %s1631_s24, 4   ;;  %s2110_s18 = smov %s1557_s19 }
 0x3c8   : > { %s2111_s19 = smov %s1561_s20  ;;  %s2112_s20 = smov %s1642_s27 }
 0x3c9   : > { %s2113_s21 = smov %s1631_s24  ;;  %18 = sbr.rel (!%p16_p13) target bundleno = 4 (0x4), region = 80 }
 0x3ce   :  { %1046 = vsyncpa [#allocation3], 1 }
 0x3cf   :  { %1048 = vsyncpa [#allocation3 + $0x1], 1 }
 0x3d0   :  { %1049 = vsyncpa [#allocation4], 1 }
 0x3d1   :  { %1051 = vsyncpa [#allocation4 + $0x1], 1 }

</bundles_post_ra>
